<compile_context>
chip_gen: v7x
topology: tpu7x:2x2x1
jax: 0.10.0
libtpu: 0.0.40
codegen_flags: <defaults>
</compile_context>

<pallas_src>
import functools

import jax
import jax.numpy as jnp
from jax import lax
from jax.experimental import pallas as pl
from jax.experimental.pallas import tpu as pltpu


def _patch_nce_kernel(q_ref, k_ref, inv_kn_ref, loss_ref, *, nce_T: float, tile_m: int):
    """One grid step: rows [i*tile_m, (i+1)*tile_m) of the loss.

    q_ref:      (tile_m, D) tile of feat_q (native dtype -> MXU operand)
    k_ref:      (B, D) full feat_k, resident across all grid steps
    inv_kn_ref: (1, B) precomputed 1/||k_j|| (f32), resident
    loss_ref:   (1, tile_m) lane-dense output slab
    """
    i = pl.program_id(0)
    row_off = pl.multiple_of(i * tile_m, tile_m)

    q = q_ref[...]                                   # (TM, D) native dtype for MXU
    qf = q.astype(jnp.float32)
    inv_T = jnp.float32(1.0 / nce_T)
    eps = jnp.float32(1e-8)

    # Row norms of this q tile only (O(TM*D), done once per row overall).
    qn = jnp.sqrt(jnp.sum(qf * qf, axis=-1, keepdims=True))          # (TM, 1)
    inv_qn = jnp.float32(1.0) / jnp.maximum(qn, eps)                 # (TM, 1)

    # ---- Positive logit: exact row-wise dot against the aligned k rows,
    #      with torch's clamp on the *product* of norms.
    k_pos = k_ref[pl.ds(row_off, tile_m), :].astype(jnp.float32)     # (TM, D)
    kn_pos = jnp.sqrt(jnp.sum(k_pos * k_pos, axis=-1, keepdims=True))
    pos_dot = jnp.sum(qf * k_pos, axis=-1, keepdims=True)            # (TM, 1)
    l_pos = (pos_dot / jnp.maximum(qn * kn_pos, eps)) * inv_T        # (TM, 1)

    # ---- Negative logits: (TM, B) on the MXU, contracting D, f32 accumulation.
    dots = lax.dot_general(q, k_ref[...], (((1,), (1,)), ((), ())),
                           preferred_element_type=jnp.float32)       # (TM, B)
    # One fused elementwise pass: fold 1/T and both per-vector inverse norms.
    logits = dots * (inv_qn * inv_T) * inv_kn_ref[...]               # (TM, B)

    # ---- CrossEntropy(target=0) == logsumexp(row) - l_pos.
    # No diagonal mask: torch's -10/T fill contributes exp(-10/T - m) == 0 in
    # f32, and logits[i, i] already equals the positive logit, so the plain row
    # logsumexp matches the (B+1)-column torch logsumexp.
    # Analytic shift m = 1/T (cosine <= 1): exponents lie in [-2/T, 0].
    sum_exp = jnp.sum(jnp.exp(logits - inv_T), axis=-1, keepdims=True)  # (TM, 1)
    lse = inv_T + jnp.log(sum_exp)
    loss_ref[...] = (lse - l_pos).T                                   # (1, TM) lane-dense


def _pick_tile_m(B: int, D: int, itemsize: int) -> int:
    """Row-tile size. Lane-dense (1, tm) output blocks must be 128-divisible or
    full-extent, so only those tm are emitted."""
    if B <= 128 or B % 128 != 0:
        return B                       # single full-extent block (always legal)
    # Keep ~4 (tm, B) f32 temporaries + resident k comfortably under the v7x
    # per-TC VMEM (64 MiB), and prefer >= 2 grid steps so both v7x TensorCores
    # get work (extra steps cost ~0.35us each on single-TC v5e/v6e: negligible).
    budget = 40 << 20
    for tm in range(512, 127, -128):
        if B % tm != 0 or B // tm < 2:
            continue
        if 4 * tm * B * 4 + 2 * B * D * itemsize <= budget:
            return tm
    # Either B is itself a single 128..512 block, or even tm=128 blows the
    # budget (B in the several-100K range -> would want a column-tiled online
    # logsumexp variant).  Fall back to the largest legal tile.
    return 128 if B > 512 else B


def _vmem_limit_bytes(B: int, D: int, tm: int, itemsize: int) -> int:
    est = (2 * B * D * itemsize        # resident k (double-buffered by default)
           + 2 * tm * D * itemsize     # q tile double buffer
           + 2 * B * 4                 # inv_kn double buffer
           + 2 * tm * 4                # output slab double buffer
           + 5 * tm * B * 4)           # (tm, B) f32 temporaries
    try:
        info = pltpu.get_tpu_info()
        cap = int(getattr(info, "vmem_capacity_bytes", 64 << 20))
    except Exception:
        cap = 64 << 20                 # assume the most restrictive (v7x per-TC)
    return int(min(int(cap * 0.9), max(2 * est, 32 << 20)))


def patch_nce_loss(feat_q, feat_k, nce_T: float = 0.07, tile_m: int | None = None):
    """Pallas TPU implementation of PatchNCELoss.forward (reduction='none')."""
    assert feat_q.shape == feat_k.shape and feat_q.ndim == 2
    B, D = feat_q.shape
    itemsize = jnp.dtype(feat_q.dtype).itemsize
    tm = tile_m if tile_m is not None else _pick_tile_m(B, D, itemsize)
    assert B % tm == 0
    assert tm == B or tm % 128 == 0, "output lane block must be 128-divisible or full-extent"
    grid = (B // tm,)

    # Hoisted out of the grid loop: k norms never change across row tiles.
    kf = feat_k.astype(jnp.float32)
    kn = jnp.sqrt(jnp.sum(kf * kf, axis=-1))
    inv_kn = (jnp.float32(1.0) / jnp.maximum(kn, jnp.float32(1e-8))).reshape(1, B)

    out = pl.pallas_call(
        functools.partial(_patch_nce_kernel, nce_T=float(nce_T), tile_m=tm),
        out_shape=jax.ShapeDtypeStruct((1, B), jnp.float32),
        grid=grid,
        in_specs=[
            pl.BlockSpec((tm, D), lambda i: (i, 0)),   # row tile of q (double-buffered)
            pl.BlockSpec((B, D), lambda i: (0, 0)),    # full k, resident across the grid
            pl.BlockSpec((1, B), lambda i: (0, 0)),    # precomputed 1/||k||, resident
        ],
        out_specs=pl.BlockSpec((1, tm), lambda i: (0, i)),  # lane-dense loss slab
        compiler_params=pltpu.CompilerParams(
            dimension_semantics=("parallel",),          # megacore sharding on v7x
            vmem_limit_bytes=_vmem_limit_bytes(B, D, tm, itemsize),
        ),
    )(feat_q, feat_k, inv_kn)
    return out[0]   # (B,)


def _patch_nce_loss_ref(feat_q, feat_k, nce_T: float = 0.07):
    """Pure-JAX reference mirroring the PyTorch module, for verification."""
    q = feat_q.astype(jnp.float32)
    k = feat_k.astype(jnp.float32)
    B = q.shape[0]
    eps = 1e-8
    qn = jnp.linalg.norm(q, axis=-1)
    kn = jnp.linalg.norm(k, axis=-1)
    sim = (q @ k.T) / jnp.maximum(qn[:, None] * kn[None, :], eps)
    l_pos = jnp.diagonal(sim)[:, None]
    l_neg = jnp.where(jnp.eye(B, dtype=bool), -10.0, sim)
    out = jnp.concatenate([l_pos, l_neg], axis=1) / nce_T
    lse = jax.scipy.special.logsumexp(out, axis=-1)
    return lse - out[:, 0]


if __name__ == "__main__":
    key = jax.random.PRNGKey(0)
    kq, kk = jax.random.split(key)

    # Small shape consistent with the module: (batch * num_patches, feat_dim).
    B, D = 8, 32
    feat_q = jax.random.normal(kq, (B, D), dtype=jnp.float32)
    feat_k = jax.random.normal(kk, (B, D), dtype=jnp.float32)

    loss = jax.block_until_ready(patch_nce_loss(feat_q, feat_k))
    ref = _patch_nce_loss_ref(feat_q, feat_k)
    assert loss.shape == (B,)
    assert jnp.allclose(loss, ref, atol=2e-3, rtol=2e-3), (loss, ref)

    # Larger case exercising the multi-program row grid (dynamic row offset,
    # 2 grid steps -> both v7x TensorCores busy).
    B2, D2 = 256, 32
    q2 = jax.random.normal(kq, (B2, D2), dtype=jnp.float32)
    k2 = jax.random.normal(kk, (B2, D2), dtype=jnp.float32)
    loss2 = jax.block_until_ready(patch_nce_loss(q2, k2))
    ref2 = _patch_nce_loss_ref(q2, k2)
    assert loss2.shape == (B2,)
    assert jnp.allclose(loss2, ref2, atol=2e-3, rtol=2e-3), float(
        jnp.max(jnp.abs(loss2 - ref2)))

    print("KERNEL_OK")
</pallas_src>

<mosaic_0001>
module attributes {stable_mosaic.version = 11 : i64} {
  func.func @_patch_nce_kernel(%arg0: i32, %arg1: memref<8x32xf32, #tpu.memory_space<vmem>>, %arg2: memref<8x32xf32, #tpu.memory_space<vmem>>, %arg3: memref<1x8xf32, #tpu.memory_space<vmem>>, %arg4: memref<1x8xf32, #tpu.memory_space<vmem>>) attributes {dimension_semantics = [#tpu.dimension_semantics<parallel>], iteration_bounds = array<i64: 1>, scalar_prefetch = 0 : i64, scratch_operands = 0 : i64, tpu.core_type = #tpu.core_type<tc>, window_params = [{transform_indices = @transform_0, window_bounds = array<i64: 8, 32>}, {pipeline_mode = #tpu.pipeline_mode<synchronous>, transform_indices = @transform_1, window_bounds = array<i64: 8, 32>}, {pipeline_mode = #tpu.pipeline_mode<synchronous>, transform_indices = @transform_2, window_bounds = array<i64: 1, 8>}, {transform_indices = @transform_3, window_bounds = array<i64: 1, 8>}]} {
    %c8_i32 = arith.constant 8 : i32
    %0 = arith.muli %arg0, %c8_i32 : i32
    %1 = tpu.assume_multiple %0, 8 : i32
    %c0 = arith.constant 0 : index
    %c0_0 = arith.constant 0 : index
    %2 = vector.load %arg1[%c0, %c0_0] : memref<8x32xf32, #tpu.memory_space<vmem>>, vector<8x32xf32>
    %3 = arith.mulf %2, %2 : vector<8x32xf32>
    %cst = arith.constant dense<0.000000e+00> : vector<8xf32>
    %4 = vector.multi_reduction <add>, %3, %cst [1] : vector<8x32xf32> to vector<8xf32>
    %5 = vector.shape_cast %4 : vector<8xf32> to vector<8x1xf32>
    %6 = math.sqrt %5 : vector<8x1xf32>
    %cst_1 = arith.constant 9.99999993E-9 : f32
    %7 = vector.broadcast %cst_1 : f32 to vector<8x1xf32>
    %8 = arith.maximumf %6, %7 : vector<8x1xf32>
    %cst_2 = arith.constant 1.000000e+00 : f32
    %9 = vector.broadcast %cst_2 : f32 to vector<8x1xf32>
    %10 = arith.divf %9, %8 : vector<8x1xf32>
    %11 = arith.index_cast %1 : i32 to index
    %c0_3 = arith.constant 0 : index
    %12 = vector.load %arg2[%11, %c0_3] : memref<8x32xf32, #tpu.memory_space<vmem>>, vector<8x32xf32>
    %13 = arith.mulf %12, %12 : vector<8x32xf32>
    %cst_4 = arith.constant dense<0.000000e+00> : vector<8xf32>
    %14 = vector.multi_reduction <add>, %13, %cst_4 [1] : vector<8x32xf32> to vector<8xf32>
    %15 = vector.shape_cast %14 : vector<8xf32> to vector<8x1xf32>
    %16 = math.sqrt %15 : vector<8x1xf32>
    %17 = arith.mulf %2, %12 : vector<8x32xf32>
    %cst_5 = arith.constant dense<0.000000e+00> : vector<8xf32>
    %18 = vector.multi_reduction <add>, %17, %cst_5 [1] : vector<8x32xf32> to vector<8xf32>
    %19 = vector.shape_cast %18 : vector<8xf32> to vector<8x1xf32>
    %20 = arith.mulf %6, %16 : vector<8x1xf32>
    %cst_6 = arith.constant 9.99999993E-9 : f32
    %21 = vector.broadcast %cst_6 : f32 to vector<8x1xf32>
    %22 = arith.maximumf %20, %21 : vector<8x1xf32>
    %23 = arith.divf %19, %22 : vector<8x1xf32>
    %cst_7 = arith.constant 14.2857141 : f32
    %24 = vector.broadcast %cst_7 : f32 to vector<8x1xf32>
    %25 = arith.mulf %23, %24 : vector<8x1xf32>
    %c0_8 = arith.constant 0 : index
    %c0_9 = arith.constant 0 : index
    %26 = vector.load %arg2[%c0_8, %c0_9] : memref<8x32xf32, #tpu.memory_space<vmem>>, vector<8x32xf32>
    %cst_10 = arith.constant dense<0.000000e+00> : vector<8x8xf32>
    %27 = tpu.matmul %2, %26, %cst_10 {dimension_numbers = #tpu.dot_dimension_numbers<[1], [1], [0], [0], [0, 0, 1, 0], [], []>} : vector<8x32xf32>, vector<8x32xf32>, vector<8x8xf32> -> vector<8x8xf32>
    %cst_11 = arith.constant 14.2857141 : f32
    %28 = vector.broadcast %cst_11 : f32 to vector<8x1xf32>
    %29 = arith.mulf %10, %28 : vector<8x1xf32>
    %30 = vector.broadcast %29 : vector<8x1xf32> to vector<8x8xf32>
    %31 = arith.mulf %27, %30 : vector<8x8xf32>
    %c0_12 = arith.constant 0 : index
    %c0_13 = arith.constant 0 : index
    %32 = vector.load %arg3[%c0_12, %c0_13] : memref<1x8xf32, #tpu.memory_space<vmem>>, vector<1x8xf32>
    %33 = vector.broadcast %32 : vector<1x8xf32> to vector<8x8xf32>
    %34 = arith.mulf %31, %33 : vector<8x8xf32>
    %cst_14 = arith.constant 14.2857141 : f32
    %35 = vector.broadcast %cst_14 : f32 to vector<8x8xf32>
    %36 = arith.subf %34, %35 : vector<8x8xf32>
    %37 = math.exp %36 : vector<8x8xf32>
    %cst_15 = arith.constant dense<0.000000e+00> : vector<8xf32>
    %38 = vector.multi_reduction <add>, %37, %cst_15 [1] : vector<8x8xf32> to vector<8xf32>
    %39 = vector.shape_cast %38 : vector<8xf32> to vector<8x1xf32>
    %40 = math.log %39 : vector<8x1xf32>
    %cst_16 = arith.constant 14.2857141 : f32
    %41 = vector.broadcast %cst_16 : f32 to vector<8x1xf32>
    %42 = arith.addf %41, %40 : vector<8x1xf32>
    %43 = arith.subf %42, %25 : vector<8x1xf32>
    %44 = tpu.transpose %43, [1, 0] : vector<8x1xf32> -> vector<1x8xf32>
    %c0_17 = arith.constant 0 : index
    %c0_18 = arith.constant 0 : index
    %45 = vector.load %arg4[%c0_17, %c0_18] : memref<1x8xf32, #tpu.memory_space<vmem>>, vector<1x8xf32>
    tpu.vector_store %arg4[%c0_17, %c0_18], %44 {strides = array<i32>} : memref<1x8xf32, #tpu.memory_space<vmem>>, vector<1x8xf32>,
    return
  }
  func.func @transform_0(%arg0: i32) -> (i32, i32) {
    %c0_i32 = arith.constant 0 : i32
    %c0_i32_0 = arith.constant 0 : i32
    return %arg0, %c0_i32 : i32, i32
  }
  func.func @transform_1(%arg0: i32) -> (i32, i32) {
    %c0_i32 = arith.constant 0 : i32
    %c0_i32_0 = arith.constant 0 : i32
    %c0_i32_1 = arith.constant 0 : i32
    return %c0_i32, %c0_i32_0 : i32, i32
  }
  func.func @transform_2(%arg0: i32) -> (i32, i32) {
    %c0_i32 = arith.constant 0 : i32
    %c0_i32_0 = arith.constant 0 : i32
    %c0_i32_1 = arith.constant 0 : i32
    return %c0_i32, %c0_i32_0 : i32, i32
  }
  func.func @transform_3(%arg0: i32) -> (i32, i32) {
    %c0_i32 = arith.constant 0 : i32
    %c0_i32_0 = arith.constant 0 : i32
    return %c0_i32, %arg0 : i32, i32
  }
}

</mosaic_0001>

<bundles_post_ra>
// kernel: tpu_custom_call.1
= control target key start
LH: loop header
LB: loop body
LE: loop exit
PB: predicated region body
PF: predicated region fallthrough
CT: control target
= control target key end

     0   :  { %8 = vsyncpa [#allocation3], 0  ;;  %s395_s0 = inlined_call_operand.hbm [shape: f32[8,32], index: 0, kind: input, shape index: {}]   ;;  %s396_s1 = inlined_call_operand.hbm [shape: f32[8,32], index: 1, kind: input, shape index: {}]   ;;  %s397_s2 = inlined_call_operand.vmem [shape: f32[1,8], index: 2, kind: input, shape index: {}]   ;;  %s398_s3 = inlined_call_operand.hbm [shape: f32[1,8], index: 3, kind: output, shape index: {}]  }
   0x1   :  { %9 = vsyncpa [#allocation6], 0 }
   0x2   :  { %10 = vsyncpa [#allocation4], 0  ;;  %s326_s12 = smov [#allocation2]   ;;  %s327_s14 = smov [#allocation5]  }
   0x3   :  { %s17_s13 = sshll.u32 %s326_s12, 4  ;;  %s27_s15 = sshll.u32 %s327_s14, 4  ;;  %s18_s13 = int_to_ptr.vmem [resolvable:$true] %s17_s13  ;;  %s28_s15 = int_to_ptr.vmem [resolvable:$true] %s27_s15 }
   0x4   :  { %s254_s18 = scalar_lea.hbm %s395_s0, 128 }
   0x5   :  { %p255_p0 = scmp.ne.s32.totalorder %s395_s0, %s254_s18  ;;  %p258_p1 = scmp.lt.u32.totalorder %s254_s18, %s395_s0 }
   0x7   :  { %p260_p2 = pnand %p258_p1, %p255_p0 }
   0x9   :  { %263 = shalt.err (!%p260_p2)
}
   0xa   :  { %s264_s23 = scalar_lea.vmem %s18_s13, 128  ;;  %p269_p4 = scmp.lt.s32.totalorder %s18_s13, %s18_s13 }
   0xb   :  { %p265_p3 = scmp.ne.s32.totalorder %s18_s13, %s264_s23  ;;  %p270_p5 = scmp.lt.s32.totalorder %s264_s23, %s264_s23 }
   0xd   :  { %p271_p6 = por %p270_p5, %p269_p4 }
   0xf   :  { %p272_p7 = pnand %p271_p6, %p265_p3 }
  0x11   :  { %275 = shalt.err (!%p272_p7)
}
  0x12   :  { %20 = dma.hbm_to_vmem [thread:$0]  %s395_s0, 128, %s18_s13, [#allocation3]  }
  0x13   :  { %s276_s28 = scalar_lea.hbm %s396_s1, 128 }
  0x14   :  { %p277_p8 = scmp.ne.s32.totalorder %s396_s1, %s276_s28  ;;  %p280_p9 = scmp.lt.u32.totalorder %s276_s28, %s396_s1 }
  0x16   :  { %p282_p10 = pnand %p280_p9, %p277_p8 }
  0x18   :  { %285 = shalt.err (!%p282_p10)
}
  0x19   :  { %s286_s6 = scalar_lea.vmem %s28_s15, 128  ;;  %p291_p12 = scmp.lt.s32.totalorder %s28_s15, %s28_s15 }
  0x1a   :  { %p287_p11 = scmp.ne.s32.totalorder %s28_s15, %s286_s6  ;;  %p292_p13 = scmp.lt.s32.totalorder %s286_s6, %s286_s6 }
  0x1c   :  { %p293_p0 = por %p292_p13, %p291_p12 }
  0x1e   :  { %p294_p1 = pnand %p293_p0, %p287_p11 }
  0x20   :  { %297 = shalt.err (!%p294_p1)
}
  0x21   :  { %30 = dma.hbm_to_vmem [thread:$0]  %s396_s1, 128, %s28_s15, [#allocation6]  }
  0x22   :  { %320 = dma.done.wait [#allocation3], 128  }
  0x23   :  { %321 = vsyncadd [#allocation3], 4294967168 }
  0x24   :  { %322 = dma.done.wait [#allocation6], 128  }
  0x25   :  { %323 = vsyncadd [#allocation6], 4294967168  ;;  %v328_v0 = vmov 0.0   ;;  %vm329_vm0 = vmmov 0   ;;  %vm42_vm1 = vcmask 261120   ;;  %v78_v1 = vld [vmem:[#allocation5] sm:$0xff] }
  0x26   :  { %232 = vmatprep.subr.mxu0 %v328_v0  ;;  %234 = vmatprep.mubr.msk.f32.mxu0 %vm329_vm0, %v328_v0  ;;  %v40_v2 = vld [vmem:[#allocation2] sm:$0xff]  ;;  %v58_v4 = vmul.f32 %v78_v1, %v78_v1  ;;  %vm168_vm4 = vcmask 64512   ;;  %vm208_vm7 = vcmask 57344  }
  0x27   :  { %233 = vmatpush3.xpose.msk.msra.mxu0 %vm42_vm1, %v78_v1  ;;  %v41_v3 = vmul.f32 %v40_v2, %v40_v2  ;;  %v228_v17 = vld [vmem:[%s397_s2] ss:$0 sm:$0xff]  ;;  %v69_v23 = vmul.f32 %v78_v1, %v40_v2  ;;  %s330_s2 = smov [#allocation7]  }
  0x28   :  { %v59_v6 = vsel %vm42_vm1, %v58_v4, 0.0  ;;  %s216_s9 = sshll.u32 %s330_s2, 4  ;;  %s217_s9 = int_to_ptr.vmem [resolvable:$true] %s216_s9 }
  0x29   :  { %v43_v5 = vsel %vm42_vm1, %v41_v3, 0.0  ;;  %v70_v26 = vsel %vm42_vm1, %v69_v23, 0.0  ;;  %s298_s10 = scalar_lea.vmem %s217_s9, 16  ;;  %s302_s11 = scalar_lea.vmem %s217_s9, 32 }
  0x2a   :  { %235 = vmatmul.mubr.msk.f32.vlgmr.msra.gmra.mrb[0].mxu0 %vm42_vm1, %v40_v2  ;;  %44 = vadd.xlane.f32.xlu0 %v43_v5  ;;  %p299_p2 = scmp.ne.s32.totalorder %s217_s9, %s298_s10  ;;  %p303_p3 = scmp.lt.s32.totalorder %s217_s9, %s217_s9 }
  0x2b   :  { %p304_p4 = scmp.lt.s32.totalorder %s302_s11, %s298_s10 }
  0x2d   :  { %p305_p5 = por %p304_p4, %p303_p3 }
  0x2e   :  { %60 = vadd.xlane.f32.xlu0 %v59_v6 }
  0x2f   :  { %p306_p6 = pnand %p305_p5, %p299_p2 }
  0xb7   :  { %v45_v7 = vpop.xlane.xlu0 %44 }
  0xb8   :  { %242 = vrsqrt.f32 %v45_v7  ;;  %vm48_vm2 = vcmp.eq.f32.partialorder %v45_v7, inf  ;;  %v51_v10 = vand.u32 2147483648, %v45_v7  ;;  %vm50_vm3 = vcmp.eq.f32.partialorder %v45_v7, 0.0 }
  0xbb   :  { %v61_v27 = vpop.xlane.xlu0 %60 }
  0xbc   :  { %vm64_vm5 = vcmp.eq.f32.partialorder %v61_v27, inf  ;;  %v67_v30 = vand.u32 2147483648, %v61_v27  ;;  %vm66_vm6 = vcmp.eq.f32.partialorder %v61_v27, 0.0 }
  0xc2   :  { %v243_v8 = vpop.eup %242 }
  0xc3   :  { %v47_v9 = vmul.f32 %v243_v8, %v45_v7 }
  0xc5   :  { %v49_v11 = vsel %vm48_vm2, %v45_v7, %v47_v9 }
  0xc6   :  { %v52_v12 = vsel %vm50_vm3, %v51_v10, %v49_v11 }
  0xc7   :  { %v53_v13 = vmax.f32 %v52_v12, 1e-08 }
  0xc9   :  { %244 = vrcp.f32 %v53_v13 }
  0xd3   :  { %v245_v14 = vpop.eup %244 }
  0xd4   :  { %v155_v15 = vmul.f32 14.285714, %v245_v14 }
  0xfd   :  { %v151_v16 = vpop.f32.mrb[0].mxu0 }
  0xfe   :  { %v156_v18 = vmul.f32 %v155_v15, %v151_v16  ;;  %v236_v19 = vpop.f32.mrb[1].mxu0 }
 0x100   :  { %v164_v20 = vmul.f32 %v228_v17, %v156_v18 }
 0x102   :  { %v229_v21 = vadd.f32 -14.285714, %v164_v20 }
 0x104   :  { %v166_v22 = vmul.f32 1.442695, %v229_v21 }
 0x106   :  { %246 = vpow2.f32 %v166_v22 }
 0x107   :  { %248 = vrsqrt.f32 %v61_v27 }
 0x110   :  { %v247_v24 = vpop.eup %246 }
 0x111   :  { %v169_v25 = vsel %vm168_vm4, %v247_v24, 0.0  ;;  %v249_v28 = vpop.eup %248 }
 0x112   :  { %170 = vadd.xlane.f32.xlu1 %v169_v25  ;;  %v63_v29 = vmul.f32 %v249_v28, %v61_v27 }
 0x114   :  { %v65_v31 = vsel %vm64_vm5, %v61_v27, %v63_v29 }
 0x115   :  { %v68_v32 = vsel %vm66_vm6, %v67_v30, %v65_v31 }
 0x116   :  { %71 = vadd.xlane.f32.xlu1 %v70_v26  ;;  %v73_v33 = vmul.f32 %v68_v32, %v52_v12 }
 0x118   :  { %v74_v34 = vmax.f32 %v73_v33, 1e-08 }
 0x11a   :  { %250 = vrcp.f32 %v74_v34 }
 0x124   :  { %v251_v37 = vpop.eup %250 }
 0x19f   :  { %v171_v35 = vpop.xlane.xlu1 %170 }
 0x1a0   :  { %252 = vlog2.f32 %v171_v35 }
 0x1a3   :  { %v72_v36 = vpop.xlane.xlu1 %71 }
 0x1a4   :  { %v76_v38 = vmul.f32 %v251_v37, %v72_v36 }
 0x1a6   :  { %v77_v41 = vmul.f32 14.285714, %v76_v38 }
 0x1aa   :  { %v253_v39 = vpop.eup %252 }
 0x1ab   :  { %v173_v40 = vmul.f32 0.6931472, %v253_v39 }
 0x1ad   :  { %v174_v42 = vadd.f32 14.285714, %v173_v40 }
 0x1af   :  { %v175_v43 = vsub.f32 %v174_v42, %v77_v41 }
 0x1b1   :  { %176 = vxpose.xlu0.b32.start.end [1/1] (short) (narrow) %v175_v43, 8 }
 0x231   :  { %v192_v44 = vpop.trf.xlu0 }
 0x232   :  { %209 = vst.msk [vmem:[#allocation7] sm:$0x1] %vm208_vm7, %v192_v44 }
 0x233   :  { %309 = shalt.err (!%p306_p6)
}
 0x234   :  { %s310_s14 = scalar_lea.hbm %s398_s3, 16 }
 0x235   :  { %p311_p7 = scmp.ne.s32.totalorder %s398_s3, %s310_s14  ;;  %p314_p8 = scmp.lt.u32.totalorder %s310_s14, %s398_s3 }
 0x237   :  { %p316_p9 = pnand %p314_p8, %p311_p7 }
 0x239   :  { %319 = shalt.err (!%p316_p9)
}
 0x23a   :  { %219 = dma.vmem_to_hbm [thread:$0]  %s217_s9, 16, %s398_s3, [#allocation4]  }
 0x23b   :  { %324 = dma.done.wait [#allocation4], 16  }
 0x23c   :  { %325 = vsyncadd [#allocation4], 4294967280 }
 0x23d   :  { %223 = vsyncpa [#allocation3], 1 }
 0x23e   :  { %224 = vsyncpa [#allocation6], 1 }
 0x23f   :  { %225 = vsyncpa [#allocation4], 1 }

</bundles_post_ra>
